<compile_context>
chip_gen: v5e
topology: v5e:2x2
jax: 0.10.0
libtpu: 0.0.40
codegen_flags: <defaults>
</compile_context>

<pallas_src>
import jax
import jax.numpy as jnp
import numpy as np
from jax import lax
from jax.experimental import pallas as pl
from jax.experimental.pallas import tpu as pltpu

SCALE_FACTOR = 0.04
INV_SCALE = 1.0 / SCALE_FACTOR  # 25.0


def make_mha_kernel(batch: int, seq: int, d_model: int, head: int, d_k: int):
    """Single-program MHA kernel; all sizes are static (closure)."""
    hd = head * d_k                                  # == d_forward
    dn_qkt = (((2,), (2,)), ((0,), (0,)))            # 'bqd,bkd->bqk' (no transpose)
    dn_bmm = (((2,), (1,)), ((0,), (0,)))            # 'bqk,bkd->bqd'

    def mha_kernel(x_ref, w_ref, out_ref):
        # x_ref: (B*S, d_model)
        # w_ref: packed weight slab (d_model + hd + 1, max(3*hd, d_model)):
        #   rows [0, d_model)              cols [0, 3*hd)    -> Wqkv^T
        #   rows [d_model, d_model+hd)     cols [0, d_model) -> Wo^T
        #   row   d_model+hd               cols [0, d_model) -> output bias
        x2d = x_ref[...]                                              # (B*S, D)
        wqkv = w_ref[0:d_model, 0:3 * hd]                             # (D, 3*hd)
        wo_t = w_ref[d_model:d_model + hd, 0:d_model]                 # (hd, D)
        bo = w_ref[d_model + hd:d_model + hd + 1, 0:d_model]          # (1, D)

        # ---- fused QKV projection: one lane-dense 2-D matmul ----
        qkv = jnp.dot(x2d, wqkv, preferred_element_type=jnp.float32)  # (B*S, 3*hd)

        def to_heads(t2d):
            # (B*S, head*d_k) -> (B*head, S, d_k), using only layout-preserving
            # reshapes + static lane slices (head is small & static).
            t3 = t2d.reshape(batch, seq, hd)
            parts = [t3[:, :, h * d_k:(h + 1) * d_k] for h in range(head)]
            t4 = jnp.stack(parts, axis=1)                             # (B, head, S, d_k)
            return t4.reshape(batch * head, seq, d_k)

        q = to_heads(qkv[:, 0 * hd:1 * hd])
        k = to_heads(qkv[:, 1 * hd:2 * hd])
        v = to_heads(qkv[:, 2 * hd:3 * hd])

        # ---- attention core, batched over (B*head) ----
        scores = lax.dot_general(q, k, dn_qkt,
                                 preferred_element_type=jnp.float32)  # (BH, S, S)
        # Reference semantics: masked_fill(scores == 0, -1e9), then /scale.
        scores = jnp.where(scores == 0.0, jnp.float32(-1e9), scores)
        scores = scores * jnp.float32(INV_SCALE)

        m = jnp.max(scores, axis=-1, keepdims=True)
        e = jnp.exp(scores - m)
        denom = jnp.sum(e, axis=-1, keepdims=True)
        attn = e * pl.reciprocal(denom, approx=True)                  # EUP, not VALU
        z = lax.dot_general(attn, v, dn_bmm,
                            preferred_element_type=jnp.float32)       # (BH, S, d_k)

        # ---- concat heads back onto the lane axis + fused output Linear ----
        z4 = z.reshape(batch, head, seq, d_k)
        zcat = jnp.concatenate([z4[:, h] for h in range(head)], axis=-1)  # (B, S, hd)
        z2d = zcat.reshape(batch * seq, hd)                               # (B*S, hd)
        out_ref[...] = jnp.dot(z2d, wo_t,
                               preferred_element_type=jnp.float32) + bo

    return mha_kernel


def multi_head_attention(x, Wq, Wk, Wv, Wo, bo):
    """x: (B, S, d_model); Wq/Wk/Wv: (head, d_k, d_model) (PyTorch Linear
    layout, bias=False); Wo: (d_model, d_forward); bo: (d_model,)."""
    B, S, D = x.shape
    head, d_k, _ = Wq.shape
    hd = head * d_k                                   # d_forward

    # --- layout plumbing (plain JAX glue, no B*head replication) ----------
    x2d = x.reshape(B * S, D)

    def pack_head_weight(W):
        # (head, d_k, D) -> (D, head*d_k), column order (head, d_k)
        return jnp.transpose(W, (2, 0, 1)).reshape(D, hd)

    wqkv = jnp.concatenate(
        [pack_head_weight(Wq), pack_head_weight(Wk), pack_head_weight(Wv)],
        axis=1)                                                        # (D, 3*hd)

    n_rows = D + hd + 1
    n_cols = max(3 * hd, D)
    w_slab = jnp.zeros((n_rows, n_cols), jnp.float32)
    w_slab = w_slab.at[:D, :3 * hd].set(wqkv)
    w_slab = w_slab.at[D:D + hd, :D].set(Wo.T)                         # (hd, D)
    w_slab = w_slab.at[D + hd, :D].set(bo)

    kernel = make_mha_kernel(B, S, D, head, d_k)
    out2d = pl.pallas_call(
        kernel,
        out_shape=jax.ShapeDtypeStruct((B * S, D), jnp.float32),
        grid=(1,),                                    # single program
        in_specs=[
            pl.BlockSpec((B * S, D), lambda i: (0, 0)),        # activations
            pl.BlockSpec((n_rows, n_cols), lambda i: (0, 0)),  # packed weights
        ],
        out_specs=pl.BlockSpec((B * S, D), lambda i: (0, 0)),
        compiler_params=pltpu.CompilerParams(
            dimension_semantics=("arbitrary",)),
    )(x2d, w_slab)
    return out2d.reshape(B, S, D)


def ref_forward(x, Wq, Wk, Wv, Wo, bo, head, d_k):
    """Pure-JAX mirror of the PyTorch forward (for correctness check)."""
    B, S, _ = x.shape
    q = jnp.einsum('bsd,hkd->bhsk', x, Wq)
    k = jnp.einsum('bsd,hkd->bhsk', x, Wk)
    v = jnp.einsum('bsd,hkd->bhsk', x, Wv)
    scores = jnp.einsum('bhsk,bhtk->bhst', q, k)
    scores = jnp.where(scores == 0.0, -1e9, scores)
    attn = jax.nn.softmax(scores / SCALE_FACTOR, axis=-1)
    z = jnp.einsum('bhst,bhtk->bhsk', attn, v)
    z = jnp.transpose(z, (0, 2, 1, 3)).reshape(B, S, head * d_k)
    return z @ Wo.T + bo


if __name__ == "__main__":
    # Module hyper-params (small, consistent with the PyTorch __init__).
    d_model, d_forward, head, dropout = 32, 32, 4, 0.1
    d_k = d_forward // head
    B, S = 2, 8

    key = jax.random.PRNGKey(0)
    kx, kq, kk_, kv, kwo, kbo = jax.random.split(key, 6)

    x = jax.random.normal(kx, (B, S, d_model), dtype=jnp.float32)

    # Per-head projection weights, PyTorch nn.Linear layout (out, in) = (d_k, d_model).
    Wq = 0.1 * jax.random.normal(kq, (head, d_k, d_model), dtype=jnp.float32)
    Wk = 0.1 * jax.random.normal(kk_, (head, d_k, d_model), dtype=jnp.float32)
    Wv = 0.1 * jax.random.normal(kv, (head, d_k, d_model), dtype=jnp.float32)
    # Final Linear(d_forward -> d_model) with bias.
    Wo = 0.1 * jax.random.normal(kwo, (d_model, d_forward), dtype=jnp.float32)
    bo = 0.1 * jax.random.normal(kbo, (d_model,), dtype=jnp.float32)

    out = multi_head_attention(x, Wq, Wk, Wv, Wo, bo)
    out = jax.block_until_ready(out)

    expected = jax.block_until_ready(ref_forward(x, Wq, Wk, Wv, Wo, bo, head, d_k))
    assert out.shape == (B, S, d_model)
    # Tolerance accounts for the EUP approximate reciprocal used to normalize
    # the in-kernel softmax (everything else is exact f32).
    np.testing.assert_allclose(np.asarray(out), np.asarray(expected),
                               rtol=2e-3, atol=2e-3)
    print("KERNEL_OK")
</pallas_src>

<mosaic_0001>
module attributes {stable_mosaic.version = 11 : i64} {
  func.func @mha_kernel(%arg0: i32, %arg1: memref<16x32xf32, #tpu.memory_space<vmem>>, %arg2: memref<65x96xf32, #tpu.memory_space<vmem>>, %arg3: memref<16x32xf32, #tpu.memory_space<vmem>>) attributes {dimension_semantics = [#tpu.dimension_semantics<arbitrary>], iteration_bounds = array<i64: 1>, scalar_prefetch = 0 : i64, scratch_operands = 0 : i64, tpu.core_type = #tpu.core_type<tc>, window_params = [{pipeline_mode = #tpu.pipeline_mode<synchronous>, transform_indices = @transform_0, window_bounds = array<i64: 16, 32>}, {pipeline_mode = #tpu.pipeline_mode<synchronous>, transform_indices = @transform_1, window_bounds = array<i64: 65, 96>}, {pipeline_mode = #tpu.pipeline_mode<synchronous>, transform_indices = @transform_2, window_bounds = array<i64: 16, 32>}]} {
    %c0 = arith.constant 0 : index
    %c0_0 = arith.constant 0 : index
    %0 = vector.load %arg1[%c0, %c0_0] : memref<16x32xf32, #tpu.memory_space<vmem>>, vector<16x32xf32>
    %c0_1 = arith.constant 0 : index
    %c0_2 = arith.constant 0 : index
    %1 = vector.load %arg2[%c0_1, %c0_2] : memref<65x96xf32, #tpu.memory_space<vmem>>, vector<32x96xf32>
    %c32 = arith.constant 32 : index
    %c0_3 = arith.constant 0 : index
    %2 = vector.load %arg2[%c32, %c0_3] : memref<65x96xf32, #tpu.memory_space<vmem>>, vector<32x32xf32>
    %c64 = arith.constant 64 : index
    %c0_4 = arith.constant 0 : index
    %3 = vector.load %arg2[%c64, %c0_4] : memref<65x96xf32, #tpu.memory_space<vmem>>, vector<1x32xf32>
    %cst = arith.constant dense<0.000000e+00> : vector<16x96xf32>
    %4 = tpu.matmul %0, %1, %cst {dimension_numbers = #tpu.dot_dimension_numbers<[1], [0], [0], [1], [0, 0, 1, 1], [], []>} : vector<16x32xf32>, vector<32x96xf32>, vector<16x96xf32> -> vector<16x96xf32>
    %5 = vector.extract_strided_slice %4 {offsets = [0, 0], sizes = [16, 32], strides = [1, 1]} : vector<16x96xf32> to vector<16x32xf32>
    %6 = vector.shape_cast %5 : vector<16x32xf32> to vector<2x8x32xf32>
    %7 = vector.extract_strided_slice %6 {offsets = [0, 0, 0], sizes = [2, 8, 8], strides = [1, 1, 1]} : vector<2x8x32xf32> to vector<2x8x8xf32>
    %8 = vector.extract_strided_slice %6 {offsets = [0, 0, 8], sizes = [2, 8, 8], strides = [1, 1, 1]} : vector<2x8x32xf32> to vector<2x8x8xf32>
    %9 = vector.extract_strided_slice %6 {offsets = [0, 0, 16], sizes = [2, 8, 8], strides = [1, 1, 1]} : vector<2x8x32xf32> to vector<2x8x8xf32>
    %10 = vector.extract_strided_slice %6 {offsets = [0, 0, 24], sizes = [2, 8, 8], strides = [1, 1, 1]} : vector<2x8x32xf32> to vector<2x8x8xf32>
    %11 = vector.shape_cast %7 : vector<2x8x8xf32> to vector<2x1x8x8xf32>
    %12 = vector.shape_cast %8 : vector<2x8x8xf32> to vector<2x1x8x8xf32>
    %13 = vector.shape_cast %9 : vector<2x8x8xf32> to vector<2x1x8x8xf32>
    %14 = vector.shape_cast %10 : vector<2x8x8xf32> to vector<2x1x8x8xf32>
    %15 = tpu.concatenate %11, %12, %13, %14 in 1 : vector<2x1x8x8xf32>, vector<2x1x8x8xf32>, vector<2x1x8x8xf32>, vector<2x1x8x8xf32> -> vector<2x4x8x8xf32>
    %16 = vector.shape_cast %15 : vector<2x4x8x8xf32> to vector<8x8x8xf32>
    %17 = vector.extract_strided_slice %4 {offsets = [0, 32], sizes = [16, 32], strides = [1, 1]} : vector<16x96xf32> to vector<16x32xf32>
    %18 = vector.shape_cast %17 : vector<16x32xf32> to vector<2x8x32xf32>
    %19 = vector.extract_strided_slice %18 {offsets = [0, 0, 0], sizes = [2, 8, 8], strides = [1, 1, 1]} : vector<2x8x32xf32> to vector<2x8x8xf32>
    %20 = vector.extract_strided_slice %18 {offsets = [0, 0, 8], sizes = [2, 8, 8], strides = [1, 1, 1]} : vector<2x8x32xf32> to vector<2x8x8xf32>
    %21 = vector.extract_strided_slice %18 {offsets = [0, 0, 16], sizes = [2, 8, 8], strides = [1, 1, 1]} : vector<2x8x32xf32> to vector<2x8x8xf32>
    %22 = vector.extract_strided_slice %18 {offsets = [0, 0, 24], sizes = [2, 8, 8], strides = [1, 1, 1]} : vector<2x8x32xf32> to vector<2x8x8xf32>
    %23 = vector.shape_cast %19 : vector<2x8x8xf32> to vector<2x1x8x8xf32>
    %24 = vector.shape_cast %20 : vector<2x8x8xf32> to vector<2x1x8x8xf32>
    %25 = vector.shape_cast %21 : vector<2x8x8xf32> to vector<2x1x8x8xf32>
    %26 = vector.shape_cast %22 : vector<2x8x8xf32> to vector<2x1x8x8xf32>
    %27 = tpu.concatenate %23, %24, %25, %26 in 1 : vector<2x1x8x8xf32>, vector<2x1x8x8xf32>, vector<2x1x8x8xf32>, vector<2x1x8x8xf32> -> vector<2x4x8x8xf32>
    %28 = vector.shape_cast %27 : vector<2x4x8x8xf32> to vector<8x8x8xf32>
    %29 = vector.extract_strided_slice %4 {offsets = [0, 64], sizes = [16, 32], strides = [1, 1]} : vector<16x96xf32> to vector<16x32xf32>
    %30 = vector.shape_cast %29 : vector<16x32xf32> to vector<2x8x32xf32>
    %31 = vector.extract_strided_slice %30 {offsets = [0, 0, 0], sizes = [2, 8, 8], strides = [1, 1, 1]} : vector<2x8x32xf32> to vector<2x8x8xf32>
    %32 = vector.extract_strided_slice %30 {offsets = [0, 0, 8], sizes = [2, 8, 8], strides = [1, 1, 1]} : vector<2x8x32xf32> to vector<2x8x8xf32>
    %33 = vector.extract_strided_slice %30 {offsets = [0, 0, 16], sizes = [2, 8, 8], strides = [1, 1, 1]} : vector<2x8x32xf32> to vector<2x8x8xf32>
    %34 = vector.extract_strided_slice %30 {offsets = [0, 0, 24], sizes = [2, 8, 8], strides = [1, 1, 1]} : vector<2x8x32xf32> to vector<2x8x8xf32>
    %35 = vector.shape_cast %31 : vector<2x8x8xf32> to vector<2x1x8x8xf32>
    %36 = vector.shape_cast %32 : vector<2x8x8xf32> to vector<2x1x8x8xf32>
    %37 = vector.shape_cast %33 : vector<2x8x8xf32> to vector<2x1x8x8xf32>
    %38 = vector.shape_cast %34 : vector<2x8x8xf32> to vector<2x1x8x8xf32>
    %39 = tpu.concatenate %35, %36, %37, %38 in 1 : vector<2x1x8x8xf32>, vector<2x1x8x8xf32>, vector<2x1x8x8xf32>, vector<2x1x8x8xf32> -> vector<2x4x8x8xf32>
    %40 = vector.shape_cast %39 : vector<2x4x8x8xf32> to vector<8x8x8xf32>
    %cst_5 = arith.constant dense<0.000000e+00> : vector<8x8x8xf32>
    %41 = tpu.matmul %16, %28, %cst_5 {dimension_numbers = #tpu.dot_dimension_numbers<[2], [2], [1], [1], [0, 0, 0, 1, 1, 1], [0], [0]>} : vector<8x8x8xf32>, vector<8x8x8xf32>, vector<8x8x8xf32> -> vector<8x8x8xf32>
    %cst_6 = arith.constant 0.000000e+00 : f32
    %42 = vector.broadcast %cst_6 : f32 to vector<8x8x8xf32>
    %43 = arith.cmpf oeq, %41, %42 : vector<8x8x8xf32>
    %cst_7 = arith.constant -1.000000e+09 : f32
    %44 = vector.broadcast %cst_7 : f32 to vector<8x8x8xf32>
    %45 = arith.select %43, %44, %41 : vector<8x8x8xi1>, vector<8x8x8xf32>
    %cst_8 = arith.constant 2.500000e+01 : f32
    %46 = vector.broadcast %cst_8 : f32 to vector<8x8x8xf32>
    %47 = arith.mulf %45, %46 : vector<8x8x8xf32>
    %cst_9 = arith.constant dense<0xFF800000> : vector<8x8xf32>
    %48 = vector.multi_reduction <maximumf>, %47, %cst_9 [2] : vector<8x8x8xf32> to vector<8x8xf32>
    %49 = vector.shape_cast %48 : vector<8x8xf32> to vector<8x8x1xf32>
    %50 = vector.broadcast %49 : vector<8x8x1xf32> to vector<8x8x8xf32>
    %51 = arith.subf %47, %50 : vector<8x8x8xf32>
    %52 = math.exp %51 : vector<8x8x8xf32>
    %cst_10 = arith.constant dense<0.000000e+00> : vector<8x8xf32>
    %53 = vector.multi_reduction <add>, %52, %cst_10 [2] : vector<8x8x8xf32> to vector<8x8xf32>
    %54 = vector.shape_cast %53 : vector<8x8xf32> to vector<8x8x1xf32>
    %55 = tpu.reciprocal %54 {approx = true} : vector<8x8x1xf32> -> vector<8x8x1xf32>
    %56 = vector.broadcast %55 : vector<8x8x1xf32> to vector<8x8x8xf32>
    %57 = arith.mulf %52, %56 : vector<8x8x8xf32>
    %cst_11 = arith.constant dense<0.000000e+00> : vector<8x8x8xf32>
    %58 = tpu.matmul %57, %40, %cst_11 {dimension_numbers = #tpu.dot_dimension_numbers<[2], [1], [1], [2], [0, 0, 0, 1, 1, 2], [0], [0]>} : vector<8x8x8xf32>, vector<8x8x8xf32>, vector<8x8x8xf32> -> vector<8x8x8xf32>
    %59 = vector.shape_cast %58 : vector<8x8x8xf32> to vector<2x4x8x8xf32>
    %60 = vector.extract_strided_slice %59 {offsets = [0, 0, 0, 0], sizes = [2, 1, 8, 8], strides = [1, 1, 1, 1]} : vector<2x4x8x8xf32> to vector<2x1x8x8xf32>
    %61 = vector.shape_cast %60 : vector<2x1x8x8xf32> to vector<2x8x8xf32>
    %62 = vector.extract_strided_slice %59 {offsets = [0, 1, 0, 0], sizes = [2, 1, 8, 8], strides = [1, 1, 1, 1]} : vector<2x4x8x8xf32> to vector<2x1x8x8xf32>
    %63 = vector.shape_cast %62 : vector<2x1x8x8xf32> to vector<2x8x8xf32>
    %64 = vector.extract_strided_slice %59 {offsets = [0, 2, 0, 0], sizes = [2, 1, 8, 8], strides = [1, 1, 1, 1]} : vector<2x4x8x8xf32> to vector<2x1x8x8xf32>
    %65 = vector.shape_cast %64 : vector<2x1x8x8xf32> to vector<2x8x8xf32>
    %66 = vector.extract_strided_slice %59 {offsets = [0, 3, 0, 0], sizes = [2, 1, 8, 8], strides = [1, 1, 1, 1]} : vector<2x4x8x8xf32> to vector<2x1x8x8xf32>
    %67 = vector.shape_cast %66 : vector<2x1x8x8xf32> to vector<2x8x8xf32>
    %68 = tpu.concatenate %61, %63, %65, %67 in 2 : vector<2x8x8xf32>, vector<2x8x8xf32>, vector<2x8x8xf32>, vector<2x8x8xf32> -> vector<2x8x32xf32>
    %69 = vector.shape_cast %68 : vector<2x8x32xf32> to vector<16x32xf32>
    %cst_12 = arith.constant dense<0.000000e+00> : vector<16x32xf32>
    %70 = tpu.matmul %69, %2, %cst_12 {dimension_numbers = #tpu.dot_dimension_numbers<[1], [0], [0], [1], [0, 0, 1, 1], [], []>} : vector<16x32xf32>, vector<32x32xf32>, vector<16x32xf32> -> vector<16x32xf32>
    %71 = vector.broadcast %3 : vector<1x32xf32> to vector<16x32xf32>
    %72 = arith.addf %70, %71 : vector<16x32xf32>
    %c0_13 = arith.constant 0 : index
    %c0_14 = arith.constant 0 : index
    %73 = vector.load %arg3[%c0_13, %c0_14] : memref<16x32xf32, #tpu.memory_space<vmem>>, vector<16x32xf32>
    tpu.vector_store %arg3[%c0_13, %c0_14], %72 {strides = array<i32>} : memref<16x32xf32, #tpu.memory_space<vmem>>, vector<16x32xf32>,
    return
  }
  func.func @transform_0(%arg0: i32) -> (i32, i32) {
    %c0_i32 = arith.constant 0 : i32
    %c0_i32_0 = arith.constant 0 : i32
    %c0_i32_1 = arith.constant 0 : i32
    return %c0_i32, %c0_i32_0 : i32, i32
  }
  func.func @transform_1(%arg0: i32) -> (i32, i32) {
    %c0_i32 = arith.constant 0 : i32
    %c0_i32_0 = arith.constant 0 : i32
    %c0_i32_1 = arith.constant 0 : i32
    return %c0_i32, %c0_i32_0 : i32, i32
  }
  func.func @transform_2(%arg0: i32) -> (i32, i32) {
    %c0_i32 = arith.constant 0 : i32
    %c0_i32_0 = arith.constant 0 : i32
    %c0_i32_1 = arith.constant 0 : i32
    return %c0_i32, %c0_i32_0 : i32, i32
  }
}

</mosaic_0001>

<bundles_post_ra>
// kernel: tpu_custom_call.1
= control target key start
LH: loop header
LB: loop body
LE: loop exit
PB: predicated region body
PF: predicated region fallthrough
CT: control target
= control target key end

     0   :  { %7 = vsyncpa [#allocation3], 0  ;;  %s1052_s0 = inlined_call_operand.hbm [shape: f32[16,32], index: 0, kind: input, shape index: {}]   ;;  %s1053_s1 = inlined_call_operand.hbm [shape: f32[65,96], index: 1, kind: input, shape index: {}]   ;;  %s1054_s2 = inlined_call_operand.hbm [shape: f32[16,32], index: 2, kind: output, shape index: {}]  }
   0x1   :  { %8 = vsyncpa [#allocation6], 0 }
   0x2   :  { %9 = vsyncpa [#allocation4], 0  ;;  %s14_s11 = sshll.u32 %s1052_s0, 4  ;;  %s878_s12 = smov [#allocation2]   ;;  %s15_s11 = int_to_ptr.hbm [resolvable:$true] %s14_s11 }
   0x3   :  { %s16_s13 = sshll.u32 %s878_s12, 4  ;;  %s27_s16 = sshll.u32 %s1053_s1, 4  ;;  %s17_s13 = int_to_ptr.vmem [resolvable:$true] %s16_s13  ;;  %s28_s16 = int_to_ptr.hbm [resolvable:$true] %s27_s16 }
   0x4   :  { %s879_s17 = smov 128   ;;  %s880_s18 = smov 8  }
   0x5   :  { %22 = dma.hbm_to_vmem [thread:$0]  %s15_s11, 256, %s17_s13, [#allocation3], %s879_s17, %s879_s17, %s880_s18  }
   0x6   :  { %s881_s19 = smov [#allocation5]  }
   0x7   :  { %s29_s20 = sshll.u32 %s881_s19, 4  ;;  %s30_s20 = int_to_ptr.vmem [resolvable:$true] %s29_s20 }
   0x8   :  { %35 = dma.hbm_to_vmem [thread:$0]  %s28_s16, 1152, %s30_s20, [#allocation6], %s879_s17, %s879_s17, %s880_s18  }
   0x9   :  { %872 = dma.done.wait [#allocation3], 256  }
   0xa   :  { %873 = vsyncadd [#allocation3], 4294967040 }
   0xb   :  { %874 = dma.done.wait [#allocation6], 1152  }
   0xc   :  { %875 = vsyncadd [#allocation6], 4294966144  ;;  %v49_v0 = vld [vmem:[#allocation5 + $0x18] sm:$0xff]  ;;  %v48_v1 = vld [vmem:[#allocation5 + $0x10] sm:$0xff]  ;;  %vm55_vm0 = vcmask 261120   ;;  %s882_s0 = smov 120  }
   0xd   :  { %74 = vmatpush.msra.mxu0 %v49_v0  ;;  %v47_v2 = vld [vmem:[#allocation5 + $0x8] sm:$0xff]  ;;  %v46_v3 = vld [vmem:[#allocation5] sm:$0xff]  ;;  %v44_v4 = vld [vmem:[#allocation2] sm:$0xff]  ;;  %s883_s1 = smov 104   ;;  %s884_s21 = smov 112   ;;  %vm101_vm1 = vcmask 64512  }
   0xe   :  { %v45_v5 = vld [vmem:[#allocation2 + $0x8] sm:$0xff]  ;;  %s885_s22 = smov 96   ;;  %s886_s23 = smov 64   ;;  %vm654_vm10 = vcmask 130048   ;;  %vm657_vm11 = vcmask 195584  }
   0xf   :  { %75 = vmatpush.msra.mxu0 %v48_v1  ;;  %s887_s24 = smov 16   ;;  %s888_s25 = smov 24  }
  0x10   :  { %s889_s26 = smov [#allocation7]   ;;  %s698_s30 = sshll.u32 %s1054_s2, 4  ;;  %s699_s30 = int_to_ptr.hbm [resolvable:$true] %s698_s30 }
  0x11   :  { %76 = vmatpush.msra.mxu0 %v47_v2  ;;  %s696_s27 = sshll.u32 %s889_s26, 4  ;;  %s697_s27 = int_to_ptr.vmem [resolvable:$true] %s696_s27 }
  0x13   :  { %77 = vmatpush.msra.mxu0 %v46_v3 }
  0x14   :  { %712 = vmatmul.msk.f32.vlgmr.msra.gmra.mxu0 %vm55_vm0, %v44_v4 }
  0x1c   :  { %713 = vmatmul.msk.f32.gmra.mxu0 %vm55_vm0, %v45_v5 }
  0x91   :  { %v919_v6 = vpop.f32.mrf.mxu0 }
  0x92   :  { %87 = vrot.lane.b32.xlu0 %v919_v6, %s882_s0 }
  0x99   :  { %v922_v7 = vpop.f32.mrf.mxu0 }
  0x9a   :  { %95 = vrot.lane.b32.xlu0 %v919_v6, %s883_s1  ;;  %89 = vrot.lane.b32.xlu2 %v922_v7, %s882_s0 }
  0x9b   :  { %97 = vrot.lane.b32.xlu1 %v922_v7, %s883_s1 }
  0xa2   :  { %93 = vrot.lane.b32.xlu2 %v922_v7, %s884_s21 }
  0xa3   :  { %91 = vrot.lane.b32.xlu1 %v919_v6, %s884_s21 }
  0xaa   :  { %204 = vrot.lane.b32.xlu2 %v922_v7, %s885_s22 }
  0xab   :  { %99 = vrot.lane.b32.xlu1 %v919_v6, %s885_s22 }
  0xf4   :  { %v934_v9 = vpop.permute.xlu2 %89 }
  0xfc   :  { %v942_v12 = vpop.permute.xlu2 %93 }
 0x104   :  { %v931_v8 = vpop.permute.xlu0 %87  ;;  %v205_v15 = vpop.permute.xlu2 %204 }
 0x105   :  { %126 = vrot.lane.b32.xlu0 %v931_v8, %s885_s22 }
 0x10c   :  { %v936_v10 = vpop.permute.xlu0 %95 }
 0x10d   :  { %v938_v11 = vpop.permute.xlu1 %97  ;;  %178 = vrot.lane.b32.xlu0 %v936_v10, %s885_s22 }
 0x10e   :  { %282 = vrot.lane.b32.xlu1 %v938_v11, %s885_s22 }
 0x115   :  { %v944_v13 = vpop.permute.xlu1 %91  ;;  %230 = vrot.lane.b32.xlu0 %v934_v9, %s885_s22 }
 0x116   :  { %256 = vrot.lane.b32.xlu1 %v942_v12, %s885_s22  ;;  %152 = vrot.lane.b32.xlu2 %v944_v13, %s885_s22 }
 0x11d   :  { %v100_v14 = vpop.permute.xlu1 %99 }
 0x11e   :  { %714 = vmatpush.xpose.msk.msra.mxu1 %vm101_vm1, %v100_v14 }
 0x121   :  { %715 = vmatmul.msk.f32.vlgmr.msra.gmra.mxu1 %vm101_vm1, %v919_v6 }
 0x170   :  { %v153_v16 = vpop.permute.xlu2 %152 }
 0x171   :  { %718 = vmatpush.xpose.msk.msrb.mxu0 %vm101_vm1, %v153_v16 }
 0x174   :  { %719 = vmatmul.msk.f32.vlgmr.msrb.gmra.mxu0 %vm101_vm1, %v944_v13 }
 0x177   :  { %v127_v17 = vpop.permute.xlu0 %126 }
 0x178   :  { %716 = vmatpush.xpose.msk.msra.mxu2 %vm101_vm1, %v127_v17 }
 0x17b   :  { %717 = vmatmul.msk.f32.vlgmr.msra.gmra.mxu2 %vm101_vm1, %v931_v8 }
 0x17c   :  { %722 = vmatpush.xpose.msk.msrb.mxu2 %vm101_vm1, %v205_v15 }
 0x17f   :  { %v179_v18 = vpop.permute.xlu0 %178 }
 0x180   :  { %v283_v19 = vpop.permute.xlu1 %282  ;;  %720 = vmatpush.xpose.msk.msrb.mxu1 %vm101_vm1, %v179_v18  ;;  %v757_v18 = vpack.i.bf16 %v938_v11, %v944_v13 }
 0x181   :  { %728 = vmatpush.xpose.msk.msra.mxu2 %vm101_vm1, %v283_v19 }
 0x183   :  { %721 = vmatmul.msk.f32.vlgmr.msrb.gmra.mxu1 %vm101_vm1, %v936_v10  ;;  %723 = vmatmul.msk.f32.vlgmr.msrb.gmra.mxu2 %vm101_vm1, %v922_v7 }
 0x187   :  { %v231_v20 = vpop.permute.xlu0 %230 }
 0x188   :  { %v257_v21 = vpop.permute.xlu1 %256  ;;  %724 = vmatpush.xpose.msk.msra.mxu3 %vm101_vm1, %v231_v20 }
 0x189   :  { %726 = vmatpush.xpose.msk.msra.mxu1 %vm101_vm1, %v257_v21 }
 0x18b   :  { %725 = vmatmul.msk.f32.vlgmr.msra.gmra.mxu3 %vm101_vm1, %v934_v9  ;;  %729 = vmatmul.msk.f32.vlgmr.msra.gmra.mxu2 %vm101_vm1, %v938_v11 }
 0x18c   :  { %727 = vmatmul.msk.f32.vlgmr.msra.gmra.mxu1 %vm101_vm1, %v942_v12 }
 0x19e   :  { %v123_v22 = vpop.f32.mrf.mxu1 }
 0x19f   :  { %vm308_vm3 = vcmp.eq.f32.partialorder %v123_v22, 0.0 }
 0x1a0   :  { %v316_v27 = vsel %vm308_vm3, -1e+09, %v123_v22 }
 0x1a1   :  { %v974_v28 = vmul.f32 25.0, %v316_v27 }
 0x1a3   :  { %v332_v30 = vsel %vm101_vm1, %v974_v28, -inf }
 0x1f1   :  { %v175_v23 = vpop.f32.mrf.mxu0 }
 0x1f2   :  { %vm310_vm2 = vcmp.eq.f32.partialorder %v175_v23, 0.0 }
 0x1f3   :  { %v318_v24 = vsel %vm310_vm2, -1e+09, %v175_v23 }
 0x1f4   :  { %v326_v25 = vmul.f32 25.0, %v318_v24  ;;  %v752_v24 = vpack.i.bf16 %v931_v8, %v936_v10 }
 0x1f6   :  { %v338_v26 = vsel %vm101_vm1, %v326_v25, -inf }
 0x1f7   :  { %339 = vmax.xlane.f32.xlu1 %v338_v26 }
 0x1fe   :  { %v149_v29 = vpop.f32.mrf.mxu2 }
 0x1ff   :  { %vm309_vm4 = vcmp.eq.f32.partialorder %v149_v29, 0.0  ;;  %333 = vmax.xlane.f32.xlu1 %v332_v30 }
 0x200   :  { %v317_v31 = vsel %vm309_vm4, -1e+09, %v149_v29  ;;  %v201_v32 = vpop.f32.mrf.mxu1 }
 0x201   :  { %v325_v33 = vmul.f32 25.0, %v317_v31  ;;  %vm311_vm5 = vcmp.eq.f32.partialorder %v201_v32, 0.0  ;;  %v762_v31 = vpack.i.bf16 %v942_v12, %v934_v9 }
 0x202   :  { %v319_v34 = vsel %vm311_vm5, -1e+09, %v201_v32 }
 0x203   :  { %v327_v35 = vmul.f32 25.0, %v319_v34  ;;  %v335_v36 = vsel %vm101_vm1, %v325_v33, -inf }
 0x204   :  { %336 = vmax.xlane.f32.xlu0 %v335_v36 }
 0x205   :  { %v341_v37 = vsel %vm101_vm1, %v327_v35, -inf }
 0x206   :  { %342 = vmax.xlane.f32.xlu2 %v341_v37  ;;  %v227_v40 = vpop.f32.mrf.mxu2 }
 0x207   :  { %vm312_vm8 = vcmp.eq.f32.partialorder %v227_v40, 0.0 }
 0x208   :  { %v320_v47 = vsel %vm312_vm8, -1e+09, %v227_v40 }
 0x209   :  { %v279_v38 = vpop.f32.mrf.mxu1  ;;  %v982_v49 = vmul.f32 25.0, %v320_v47 }
 0x20a   :  { %vm314_vm6 = vcmp.eq.f32.partialorder %v279_v38, 0.0 }
 0x20b   :  { %v322_v39 = vsel %vm314_vm6, -1e+09, %v279_v38  ;;  %v344_v50 = vsel %vm101_vm1, %v982_v49, -inf }
 0x20c   :  { %v330_v41 = vmul.f32 25.0, %v322_v39 }
 0x20e   :  { %v253_v42 = vpop.f32.mrf.mxu3  ;;  %v350_v43 = vsel %vm101_vm1, %v330_v41, -inf  ;;  %v305_v48 = vpop.f32.mrf.mxu2 }
 0x20f   :  { %vm313_vm7 = vcmp.eq.f32.partialorder %v253_v42, 0.0  ;;  %351 = vmax.xlane.f32.xlu0 %v350_v43  ;;  %vm315_vm9 = vcmp.eq.f32.partialorder %v305_v48, 0.0 }
 0x210   :  { %v321_v44 = vsel %vm313_vm7, -1e+09, %v253_v42  ;;  %v323_v51 = vsel %vm315_vm9, -1e+09, %v305_v48 }
 0x211   :  { %v329_v45 = vmul.f32 25.0, %v321_v44  ;;  %v331_v52 = vmul.f32 25.0, %v323_v51 }
 0x213   :  { %v347_v46 = vsel %vm101_vm1, %v329_v45, -inf  ;;  %v353_v53 = vsel %vm101_vm1, %v331_v52, -inf }
 0x214   :  { %348 = vmax.xlane.f32.xlu2 %v347_v46 }
 0x21c   :  { %345 = vmax.xlane.f32.xlu2 %v344_v50 }
 0x224   :  { %354 = vmax.xlane.f32.xlu2 %v353_v53 }
 0x26a   :  { %v340_v54 = vpop.xlane.xlu1 %339 }
 0x26b   :  { %v358_v55 = vsub.f32 %v326_v25, %v340_v54 }
 0x26d   :  { %v368_v56 = vmul.f32 1.442695, %v358_v55 }
 0x26f   :  { %768 = vpow2.f32 %v368_v56 }
 0x272   :  { %v334_v27 = vpop.xlane.xlu1 %333 }
 0x273   :  { %v356_v30 = vsub.f32 %v974_v28, %v334_v27 }
 0x275   :  { %v987_v57 = vpop.eup %768  ;;  %v364_v8 = vmul.f32 1.442695, %v356_v30 }
 0x276   :  { %v386_v58 = vsel %vm101_vm1, %v987_v57, 0.0 }
 0x277   :  { %387 = vadd.xlane.f32.xlu2 %v386_v58  ;;  %v337_v59 = vpop.xlane.xlu0 %336 }
 0x278   :  { %v357_v60 = vsub.f32 %v325_v33, %v337_v59 }
 0x279   :  { %v343_v61 = vpop.xlane.xlu2 %342 }
 0x27a   :  { %v366_v62 = vmul.f32 1.442695, %v357_v60  ;;  %v359_v63 = vsub.f32 %v327_v35, %v343_v61 }
 0x27c   :  { %770 = vpow2.f32 %v366_v62  ;;  %v370_v0 = vmul.f32 1.442695, %v359_v63 }
 0x27e   :  { %772 = vpow2.f32 %v370_v0 }
 0x282   :  { %v991_v1 = vpop.eup %770  ;;  %v352_v2 = vpop.xlane.xlu0 %351 }
 0x283   :  { %v362_v3 = vsub.f32 %v330_v41, %v352_v2  ;;  %v383_v4 = vsel %vm101_vm1, %v991_v1, 0.0 }
 0x284   :  { %v995_v5 = vpop.eup %772  ;;  %384 = vadd.xlane.f32.xlu1 %v383_v4 }
 0x285   :  { %v376_v14 = vmul.f32 1.442695, %v362_v3  ;;  %v389_v15 = vsel %vm101_vm1, %v995_v5, 0.0 }
 0x286   :  { %390 = vadd.xlane.f32.xlu0 %v389_v15 }
 0x287   :  { %774 = vpow2.f32 %v376_v14  ;;  %v349_v16 = vpop.xlane.xlu2 %348 }
 0x288   :  { %v361_v13 = vsub.f32 %v329_v45, %v349_v16 }
 0x28a   :  { %v374_v26 = vmul.f32 1.442695, %v361_v13 }
 0x28d   :  { %v999_v17 = vpop.eup %774 }
 0x28e   :  { %v398_v19 = vsel %vm101_vm1, %v999_v17, 0.0 }
 0x28f   :  { %399 = vadd.xlane.f32.xlu0 %v398_v19  ;;  %758 = vrot.lane.b32.xlu2 %v757_v18, %s886_s23  ;;  %v346_v20 = vpop.xlane.xlu2 %345  ;;  %v53_v18 = vld [vmem:[#allocation5 + $0x38] sm:$0xff]  ;;  %v52_v19 = vld [vmem:[#allocation5 + $0x30] sm:$0xff] }
 0x290   :  { %v360_v34 = vsub.f32 %v982_v49, %v346_v20  ;;  %v51_v20 = vld [vmem:[#allocation5 + $0x28] sm:$0xff] }
 0x292   :  { %v372_v28 = vmul.f32 1.442695, %v360_v34 }
 0x297   :  { %v355_v21 = vpop.xlane.xlu2 %354 }
 0x298   :  { %v363_v22 = vsub.f32 %v331_v52, %v355_v21  ;;  %v50_v21 = vld [vmem:[#allocation5 + $0x20] sm:$0xff] }
 0x29a   :  { %v378_v23 = vmul.f32 1.442695, %v363_v22 }
 0x29c   :  { %776 = vpow2.f32 %v378_v23 }
 0x29d   :  { %753 = vrot.lane.b32.xlu1 %v752_v24, %s886_s23  ;;  %778 = vpow2.f32 %v374_v26 }
 0x29e   :  { %780 = vpow2.f32 %v364_v8 }
 0x29f   :  { %782 = vpow2.f32 %v372_v28 }
 0x2a2   :  { %v777_v25 = vpop.eup %776 }
 0x2a3   :  { %v401_v11 = vsel %vm101_vm1, %v777_v25, 0.0  ;;  %v779_v29 = vpop.eup %778 }
 0x2a4   :  { %402 = vadd.xlane.f32.xlu0 %v401_v11  ;;  %v395_v32 = vsel %vm101_vm1, %v779_v29, 0.0  ;;  %v1015_v10 = vpop.eup %780 }
 0x2a5   :  { %v380_v33 = vsel %vm101_vm1, %v1015_v10, 0.0  ;;  %v783_v9 = vpop.eup %782 }
 0x2a6   :  { %v392_v12 = vsel %vm101_vm1, %v783_v9, 0.0 }
 0x2b8   :  { %396 = vadd.xlane.f32.xlu2 %v395_v32  ;;  %763 = vrot.lane.b32.xlu0 %v762_v31, %s886_s23 }
 0x2c7   :  { %381 = vadd.xlane.f32.xlu1 %v380_v33  ;;  %v767_v33 = vld [vmem:[#allocation5 + $0x40] ss:$0 sm:$0xff] }
 0x2d0   :  { %420 = vrot.lane.b32.xlu2 %v919_v6, %s886_s23 }
 0x2d8   :  { %524 = vrot.lane.b32.xlu2 %v922_v7, %s886_s23 }
 0x2e2   :  { %393 = vadd.xlane.f32.xlu0 %v392_v12 }
 0x2ea   :  { %v388_v35 = vpop.xlane.xlu2 %387 }
 0x2eb   :  { %784 = vrcp.f32 %v388_v35 }
 0x2f1   :  { %v785_v36 = vpop.eup %784 }
 0x2f2   :  { %v759_v37 = vpop.permute.xlu2 %758  ;;  %v414_v39 = vmul.f32 %v785_v36, %v987_v57 }
 0x2f3   :  { %v760_v38 = vunpack.i.l.bf16 %v759_v37  ;;  %v761_v48 = vunpack.i.h.bf16 %v759_v37 }
 0x2f5   :  { %493 = vmatpush.msrb.mxu1 %v760_v38 }
 0x2f6   :  { %732 = vmatmul.msk.f32.vlgmr.msrb.gmra.mxu1 %vm101_vm1, %v414_v39 }
 0x2f7   :  { %v385_v6 = vpop.xlane.xlu1 %384 }
 0x2f8   :  { %786 = vrcp.f32 %v385_v6 }
 0x2f9   :  { %v391_v40 = vpop.xlane.xlu0 %390 }
 0x2fa   :  { %788 = vrcp.f32 %v391_v40 }
 0x2fe   :  { %v787_v41 = vpop.eup %786 }
 0x2ff   :  { %v413_v46 = vmul.f32 %v787_v41, %v991_v1 }
 0x300   :  { %v789_v7 = vpop.eup %788 }
 0x301   :  { %v415_v47 = vmul.f32 %v789_v7, %v995_v5 }
 0x302   :  { %v400_v42 = vpop.xlane.xlu0 %399 }
 0x30f   :  { %v754_v43 = vpop.permute.xlu1 %753 }
 0x310   :  { %v756_v44 = vunpack.i.h.bf16 %v754_v43  ;;  %v755_v45 = vunpack.i.l.bf16 %v754_v43 }
 0x312   :  { %467 = vmatpush.msra.mxu0 %v756_v44  ;;  %519 = vmatpush.msrb.mxu2 %v755_v45 }
 0x313   :  { %731 = vmatmul.msk.f32.vlgmr.msra.gmra.mxu0 %vm101_vm1, %v413_v46  ;;  %733 = vmatmul.msk.f32.vlgmr.msrb.gmra.mxu2 %vm101_vm1, %v415_v47 }
 0x314   :  { %623 = vmatpush.msra.mxu2 %v761_v48 }
 0x317   :  { %v403_v49 = vpop.xlane.xlu0 %402 }
 0x318   :  { %790 = vrcp.f32 %v403_v49 }
 0x319   :  { %792 = vrcp.f32 %v400_v42 }
 0x31e   :  { %v791_v50 = vpop.eup %790 }
 0x31f   :  { %v419_v51 = vmul.f32 %v791_v50, %v777_v25  ;;  %v793_v52 = vpop.eup %792 }
 0x320   :  { %v418_v57 = vmul.f32 %v793_v52, %v999_v17 }
 0x321   :  { %737 = vmatmul.msk.f32.vlgmr.msra.gmra.mxu2 %vm101_vm1, %v419_v51 }
 0x32a   :  { %v764_v53 = vpop.permute.xlu0 %763 }
 0x32b   :  { %v766_v54 = vunpack.i.h.bf16 %v764_v53  ;;  %v765_v55 = vunpack.i.l.bf16 %v764_v53  ;;  %v397_v56 = vpop.xlane.xlu2 %396 }
 0x32c   :  { %794 = vrcp.f32 %v397_v56 }
 0x32d   :  { %571 = vmatpush.msrb.mxu0 %v765_v55  ;;  %597 = vmatpush.msra.mxu1 %v766_v54 }
 0x32e   :  { %736 = vmatmul.msk.f32.vlgmr.msra.gmra.mxu1 %vm101_vm1, %v418_v57 }
 0x332   :  { %v795_v58 = vpop.eup %794 }
 0x333   :  { %v417_v59 = vmul.f32 %v795_v58, %v779_v29  ;;  %v421_v60 = vpop.permute.xlu2 %420 }
 0x334   :  { %441 = vmatpush.msrb.mxu3 %v421_v60 }
 0x335   :  { %735 = vmatmul.msk.f32.vlgmr.msrb.gmra.mxu0 %vm101_vm1, %v417_v59 }
 0x33a   :  { %v382_v61 = vpop.xlane.xlu1 %381 }
 0x33b   :  { %v525_v62 = vpop.permute.xlu2 %524  ;;  %796 = vrcp.f32 %v382_v61 }
 0x33c   :  { %545 = vmatpush.msra.mxu3 %v525_v62 }
 0x341   :  { %v797_v63 = vpop.eup %796 }
 0x342   :  { %v412_v0 = vmul.f32 %v797_v63, %v1015_v10 }
 0x344   :  { %730 = vmatmul.msk.f32.vlgmr.msrb.gmra.mxu3 %vm101_vm1, %v412_v0 }
 0x345   :  { %679 = vmatpush.msrb.mxu3 %v53_v18 }
 0x347   :  { %680 = vmatpush.msrb.mxu3 %v52_v19 }
 0x349   :  { %681 = vmatpush.msrb.mxu3 %v51_v20 }
 0x34b   :  { %682 = vmatpush.msrb.mxu3 %v50_v21 }
 0x355   :  { %v394_v1 = vpop.xlane.xlu0 %393 }
 0x356   :  { %798 = vrcp.f32 %v394_v1 }
 0x35c   :  { %v799_v2 = vpop.eup %798 }
 0x35d   :  { %v416_v3 = vmul.f32 %v799_v2, %v783_v9 }
 0x35f   :  { %734 = vmatmul.msk.f32.vlgmr.msra.gmra.mxu3 %vm101_vm1, %v416_v3 }
 0x373   :  { %v495_v4 = vpop.f32.mrf.mxu1 }
 0x374   :  { %638 = vrot.lane.b32.xlu2 %v495_v4, %s887_s24 }
 0x390   :  { %v469_v5 = vpop.f32.mrf.mxu0 }
 0x391   :  { %630 = vrot.lane.b32.xlu2 %v469_v5, %s880_s18 }
 0x396   :  { %v521_v14 = vpop.f32.mrf.mxu2 }
 0x397   :  { %646 = vrot.lane.b32.xlu1 %v521_v14, %s888_s25 }
 0x3a4   :  { %v625_v17 = vpop.f32.mrf.mxu2 }
 0x3ab   :  { %v599_v15 = vpop.f32.mrf.mxu1 }
 0x3ac   :  { %640 = vrot.lane.b32.xlu0 %v599_v15, %s887_s24 }
 0x3b2   :  { %v573_v16 = vpop.f32.mrf.mxu0 }
 0x3b3   :  { %632 = vrot.lane.b32.xlu2 %v573_v16, %s880_s18 }
 0x3bb   :  { %648 = vrot.lane.b32.xlu2 %v625_v17, %s888_s25 }
 0x3c7   :  { %v443_v24 = vpop.f32.mrf.mxu3 }
 0x3ce   :  { %v639_v22 = vpop.permute.xlu2 %638 }
 0x3e2   :  { %v547_v29 = vpop.f32.mrf.mxu3 }
 0x3eb   :  { %v631_v23 = vpop.permute.xlu2 %630 }
 0x3ec   :  { %v652_v25 = vsel %vm101_vm1, %v443_v24, %v631_v23 }
 0x3ed   :  { %v655_v11 = vsel %vm654_vm10, %v652_v25, %v639_v22 }
 0x409   :  { %v647_v13 = vpop.permute.xlu1 %646 }
 0x40a   :  { %v658_v26 = vsel %vm657_vm11, %v655_v11, %v647_v13 }
 0x40b   :  { %738 = vmatmul.msk.f32.vlgmr.msrb.gmra.mxu3 %vm55_vm0, %v658_v26 }
 0x40d   :  { %v633_v27 = vpop.permute.xlu2 %632 }
 0x40e   :  { %v653_v30 = vsel %vm101_vm1, %v547_v29, %v633_v27 }
 0x415   :  { %v649_v32 = vpop.permute.xlu2 %648 }
 0x41e   :  { %v641_v31 = vpop.permute.xlu0 %640 }
 0x41f   :  { %v656_v8 = vsel %vm654_vm10, %v653_v30, %v641_v31 }
 0x420   :  { %v659_v10 = vsel %vm657_vm11, %v656_v8, %v649_v32 }
 0x421   :  { %739 = vmatmul.msk.f32.gmra.mxu3 %vm55_vm0, %v659_v10 }
 0x48e   :  { %v684_v34 = vpop.f32.mrf.mxu3 }
 0x48f   :  { %v685_v28 = vadd.f32 %v767_v33, %v684_v34 }
 0x491   :  { %690 = vst.msk [vmem:[#allocation7] sm:$0xff] %vm55_vm0, %v685_v28 }
 0x4a4   :  { %v687_v9 = vpop.f32.mrf.mxu3 }
 0x4a5   :  { %v688_v12 = vadd.f32 %v767_v33, %v687_v9 }
 0x4a7   :  { %691 = vst.msk [vmem:[#allocation7 + $0x8] sm:$0xff] %vm55_vm0, %v688_v12 }
 0x4a8   :  { %704 = dma.vmem_to_hbm [thread:$0]  %s697_s27, 256, %s699_s30, [#allocation4], %s879_s17, %s879_s17, %s880_s18  }
 0x4a9   :  { %876 = dma.done.wait [#allocation4], 256  }
 0x4aa   :  { %877 = vsyncadd [#allocation4], 4294967040 }
 0x4ab   :  { %709 = vsyncpa [#allocation3], 1 }
 0x4ac   :  { %710 = vsyncpa [#allocation6], 1 }
 0x4ad   :  { %711 = vsyncpa [#allocation4], 1 }

</bundles_post_ra>
